<compile_context>
chip_gen: v7x
topology: tpu7x:2x2x1
jax: 0.10.0
libtpu: 0.0.40
codegen_flags: <defaults>
</compile_context>

<pallas_src>
import math
import functools

import jax
import jax.numpy as jnp
from jax import lax
from jax.experimental import pallas as pl
from jax.experimental.pallas import tpu as pltpu


def _self_attention_kernel(x_ref, wqkv_ref, bqkv_ref, o_ref, *,
                           num_heads, heads_per_group, compute_dtype):
    # x_ref   : (bb, S, H)  hidden states for bb batch elements
    # wqkv_ref: (H, 3H)     fused [Wq*scale | Wk | Wv], (in -> out) layout
    # bqkv_ref: (1, 3H)     fused [bq*scale | bk | bv]  (f32)
    # o_ref   : (bb, S, H)  lane-dense per-block output (post-tanh)
    bb, S, H = x_ref.shape
    d_head = H // num_heads
    gw = heads_per_group * d_head                   # lane width of one head group

    # Fused QKV projection: one (bb*S, H) x (H, 3H) MXU matmul per grid step.
    x2 = x_ref[...].reshape(bb * S, H).astype(compute_dtype)
    qkv = jnp.dot(x2, wqkv_ref[...],
                  preferred_element_type=jnp.float32) + bqkv_ref[...]   # (bb*S, 3H) f32

    for b in range(bb):                             # static unroll; bb is small
        rows = slice(b * S, (b + 1) * S)
        q = qkv[rows, 0 * H:1 * H]                  # (S, H); scale already in Wq/bq
        k = qkv[rows, 1 * H:2 * H]
        v = qkv[rows, 2 * H:3 * H]

        for g in range(num_heads // heads_per_group):
            lane0 = g * gw
            qg = q[:, lane0:lane0 + gw].astype(compute_dtype)
            kg = k[:, lane0:lane0 + gw].astype(compute_dtype)
            vg = v[:, lane0:lane0 + gw].astype(compute_dtype)

            pieces = []
            for hh in range(heads_per_group):       # static unroll inside the group
                hs = slice(hh * d_head, (hh + 1) * d_head)
                qh, kh, vh = qg[:, hs], kg[:, hs], vg[:, hs]

                # scores = qh @ kh^T: contract last dims, no transposed copy of kh.
                scores = lax.dot_general(qh, kh, (((1,), (1,)), ((), ())),
                                         preferred_element_type=jnp.float32)  # (S, S)
                # attention_mask is all zeros -> omitted.

                # numerically-stable softmax in f32; denominator on the EUP slot.
                m = jnp.max(scores, axis=-1, keepdims=True)
                e = jnp.exp(scores - m)
                probs = e * pl.reciprocal(jnp.sum(e, axis=-1, keepdims=True),
                                          approx=True)
                # TODO(synk): attention-prob dropout not implemented (inference).

                pieces.append(jnp.dot(probs.astype(compute_dtype), vh,
                                      preferred_element_type=jnp.float32))

            ctx_g = pieces[0] if len(pieces) == 1 else jnp.concatenate(pieces, axis=-1)
            # gw is a multiple of 128 (or == H) -> unmasked, lane-dense store.
            o_ref[b, :, lane0:lane0 + gw] = jnp.tanh(ctx_g).astype(o_ref.dtype)


def self_attention_forward(x, wq, wk, wv, bq, bk, bv, num_heads,
                           *, compute_dtype=jnp.float32):
    """x: (B, S, H); w*: (H, H) in (in -> out) layout; b*: (H,)."""
    B, S, H = x.shape
    if H % num_heads != 0:
        raise ValueError(f"hidden size {H} not divisible by num_heads {num_heads}")
    d_head = H // num_heads

    # Fold 1/sqrt(d_head) into the Q projection IN F32, then fuse [Wq|Wk|Wv]
    # along lanes and cast once to the compute dtype.
    scale = 1.0 / math.sqrt(d_head)
    wqkv = jnp.concatenate([wq.astype(jnp.float32) * scale,
                            wk.astype(jnp.float32),
                            wv.astype(jnp.float32)], axis=1).astype(compute_dtype)
    bqkv = jnp.concatenate([bq.astype(jnp.float32) * scale,
                            bk.astype(jnp.float32),
                            bv.astype(jnp.float32)], axis=0).reshape(1, 3 * H)

    # Head grouping so every context store is 128-lane aligned (or full-H wide).
    if d_head % 128 == 0 or 128 % d_head != 0:
        heads_per_group = 1
    else:
        heads_per_group = max(1, math.gcd(num_heads, 128 // d_head))

    # Tiny-shape path: pack several batch elements into one grid step so the
    # ~0.35us/step pipeline overhead does not dominate.
    bb = B if B * S <= 1024 else 1

    kernel = functools.partial(_self_attention_kernel,
                               num_heads=num_heads,
                               heads_per_group=heads_per_group,
                               compute_dtype=compute_dtype)

    # Explicit VMEM budget: double-buffered x/out blocks, single-buffered fused
    # weights/bias, f32 qkv intermediate and a few (S,S) score tiles.
    itm = jnp.dtype(x.dtype).itemsize
    citm = jnp.dtype(compute_dtype).itemsize
    vmem_bytes = (2 * 2 * bb * S * H * itm            # x + out, double-buffered
                  + H * 3 * H * citm + 3 * H * 4      # fused weights + bias (1 buf)
                  + bb * S * 3 * H * 4                # qkv f32 intermediate
                  + 8 * S * S * 4)                    # score/prob working set
    vmem_limit = int(min(100 * 1024 * 1024, max(4 * 1024 * 1024, 2 * vmem_bytes)))

    return pl.pallas_call(
        kernel,
        out_shape=jax.ShapeDtypeStruct((B, S, H), x.dtype),
        grid_spec=pltpu.PrefetchScalarGridSpec(
            num_scalar_prefetch=0,
            grid=(B // bb,),
            in_specs=[
                pl.BlockSpec((bb, S, H), lambda i: (i, 0, 0)),      # x
                pl.BlockSpec((H, 3 * H), lambda i: (0, 0),          # fused Wqkv
                             pipeline_mode=pl.Buffered(1)),         # grid-invariant
                pl.BlockSpec((1, 3 * H), lambda i: (0, 0),          # fused bias
                             pipeline_mode=pl.Buffered(1)),
            ],
            out_specs=pl.BlockSpec((bb, S, H), lambda i: (i, 0, 0)),
        ),
        compiler_params=pltpu.CompilerParams(
            dimension_semantics=("parallel",),   # batch axis: megacore split on v7x
            vmem_limit_bytes=vmem_limit),
    )(x, wqkv, bqkv)


def _reference(x, wq, wk, wv, bq, bk, bv, num_heads):
    B, S, H = x.shape
    dH = H // num_heads
    q = (x @ wq + bq).reshape(B, S, num_heads, dH).transpose(0, 2, 1, 3)
    k = (x @ wk + bk).reshape(B, S, num_heads, dH).transpose(0, 2, 1, 3)
    v = (x @ wv + bv).reshape(B, S, num_heads, dH).transpose(0, 2, 1, 3)
    scores = jnp.einsum("bhqd,bhkd->bhqk", q, k) / math.sqrt(dH)
    probs = jax.nn.softmax(scores, axis=-1)
    ctx = jnp.einsum("bhqk,bhkd->bhqd", probs, v)
    ctx = ctx.transpose(0, 2, 1, 3).reshape(B, S, H)
    return jnp.tanh(ctx)


if __name__ == "__main__":
    # Small config: batch=2, max_seq_length=8, hidden_size=32, num_heads=4.
    B, S, H, NH = 2, 8, 32, 4

    key = jax.random.PRNGKey(0)
    kx, kq, kk, kv, kbq, kbk, kbv = jax.random.split(key, 7)

    x = jax.random.normal(kx, (B, S, H), dtype=jnp.float32)
    w_scale = 1.0 / math.sqrt(H)
    wq = jax.random.normal(kq, (H, H), dtype=jnp.float32) * w_scale
    wk = jax.random.normal(kk, (H, H), dtype=jnp.float32) * w_scale
    wv = jax.random.normal(kv, (H, H), dtype=jnp.float32) * w_scale
    bq = jax.random.normal(kbq, (H,), dtype=jnp.float32) * 0.02
    bk = jax.random.normal(kbk, (H,), dtype=jnp.float32) * 0.02
    bv = jax.random.normal(kbv, (H,), dtype=jnp.float32) * 0.02

    ref = _reference(x, wq, wk, wv, bq, bk, bv, NH)

    # f32 compute path: tight agreement (only the approx softmax reciprocal differs).
    out_f32 = jax.block_until_ready(
        self_attention_forward(x, wq, wk, wv, bq, bk, bv, NH,
                               compute_dtype=jnp.float32))
    assert out_f32.shape == (B, S, H)
    assert jnp.allclose(out_f32, ref, atol=5e-3, rtol=5e-3)

    # bf16 matmul-input path (MXU-optimal on v5e/v6e/v7x): looser tolerance.
    out_bf16 = jax.block_until_ready(
        self_attention_forward(x, wq, wk, wv, bq, bk, bv, NH,
                               compute_dtype=jnp.bfloat16))
    assert out_bf16.shape == (B, S, H)
    assert jnp.allclose(out_bf16, ref, atol=3e-2, rtol=3e-2)

    print("KERNEL_OK")
</pallas_src>

<mosaic_0001>
module attributes {stable_mosaic.version = 11 : i64} {
  func.func @_self_attention_kernel(%arg0: i32, %arg1: memref<2x8x32xf32, #tpu.memory_space<vmem>>, %arg2: memref<32x96xf32, #tpu.memory_space<vmem>>, %arg3: memref<1x96xf32, #tpu.memory_space<vmem>>, %arg4: memref<2x8x32xf32, #tpu.memory_space<vmem>>) attributes {dimension_semantics = [#tpu.dimension_semantics<parallel>], iteration_bounds = array<i64: 1>, scalar_prefetch = 0 : i64, scratch_operands = 0 : i64, tpu.core_type = #tpu.core_type<tc>, window_params = [{transform_indices = @transform_0, window_bounds = array<i64: 2, 8, 32>}, {pipeline_mode = #tpu.pipeline_mode<synchronous>, transform_indices = @transform_1, window_bounds = array<i64: 32, 96>}, {pipeline_mode = #tpu.pipeline_mode<synchronous>, transform_indices = @transform_2, window_bounds = array<i64: 1, 96>}, {transform_indices = @transform_3, window_bounds = array<i64: 2, 8, 32>}]} {
    %c0 = arith.constant 0 : index
    %c0_0 = arith.constant 0 : index
    %c0_1 = arith.constant 0 : index
    %0 = vector.load %arg1[%c0, %c0_0, %c0_1] : memref<2x8x32xf32, #tpu.memory_space<vmem>>, vector<2x8x32xf32>
    %1 = vector.shape_cast %0 : vector<2x8x32xf32> to vector<16x32xf32>
    %c0_2 = arith.constant 0 : index
    %c0_3 = arith.constant 0 : index
    %2 = vector.load %arg2[%c0_2, %c0_3] : memref<32x96xf32, #tpu.memory_space<vmem>>, vector<32x96xf32>
    %cst = arith.constant dense<0.000000e+00> : vector<16x96xf32>
    %3 = tpu.matmul %1, %2, %cst {dimension_numbers = #tpu.dot_dimension_numbers<[1], [0], [0], [1], [0, 0, 1, 1], [], []>} : vector<16x32xf32>, vector<32x96xf32>, vector<16x96xf32> -> vector<16x96xf32>
    %c0_4 = arith.constant 0 : index
    %c0_5 = arith.constant 0 : index
    %4 = vector.load %arg3[%c0_4, %c0_5] : memref<1x96xf32, #tpu.memory_space<vmem>>, vector<1x96xf32>
    %5 = vector.broadcast %4 : vector<1x96xf32> to vector<16x96xf32>
    %6 = arith.addf %3, %5 : vector<16x96xf32>
    %7 = vector.extract_strided_slice %6 {offsets = [0, 0], sizes = [8, 32], strides = [1, 1]} : vector<16x96xf32> to vector<8x32xf32>
    %8 = vector.extract_strided_slice %6 {offsets = [0, 32], sizes = [8, 32], strides = [1, 1]} : vector<16x96xf32> to vector<8x32xf32>
    %9 = vector.extract_strided_slice %6 {offsets = [0, 64], sizes = [8, 32], strides = [1, 1]} : vector<16x96xf32> to vector<8x32xf32>
    %10 = vector.extract_strided_slice %7 {offsets = [0, 0], sizes = [8, 8], strides = [1, 1]} : vector<8x32xf32> to vector<8x8xf32>
    %11 = vector.extract_strided_slice %8 {offsets = [0, 0], sizes = [8, 8], strides = [1, 1]} : vector<8x32xf32> to vector<8x8xf32>
    %12 = vector.extract_strided_slice %9 {offsets = [0, 0], sizes = [8, 8], strides = [1, 1]} : vector<8x32xf32> to vector<8x8xf32>
    %cst_6 = arith.constant dense<0.000000e+00> : vector<8x8xf32>
    %13 = tpu.matmul %10, %11, %cst_6 {dimension_numbers = #tpu.dot_dimension_numbers<[1], [1], [0], [0], [0, 0, 1, 0], [], []>} : vector<8x8xf32>, vector<8x8xf32>, vector<8x8xf32> -> vector<8x8xf32>
    %cst_7 = arith.constant dense<0xFF800000> : vector<8xf32>
    %14 = vector.multi_reduction <maximumf>, %13, %cst_7 [1] : vector<8x8xf32> to vector<8xf32>
    %15 = vector.shape_cast %14 : vector<8xf32> to vector<8x1xf32>
    %16 = vector.broadcast %15 : vector<8x1xf32> to vector<8x8xf32>
    %17 = arith.subf %13, %16 : vector<8x8xf32>
    %18 = math.exp %17 : vector<8x8xf32>
    %cst_8 = arith.constant dense<0.000000e+00> : vector<8xf32>
    %19 = vector.multi_reduction <add>, %18, %cst_8 [1] : vector<8x8xf32> to vector<8xf32>
    %20 = vector.shape_cast %19 : vector<8xf32> to vector<8x1xf32>
    %21 = tpu.reciprocal %20 {approx = true} : vector<8x1xf32> -> vector<8x1xf32>
    %22 = vector.broadcast %21 : vector<8x1xf32> to vector<8x8xf32>
    %23 = arith.mulf %18, %22 : vector<8x8xf32>
    %cst_9 = arith.constant dense<0.000000e+00> : vector<8x8xf32>
    %24 = tpu.matmul %23, %12, %cst_9 {dimension_numbers = #tpu.dot_dimension_numbers<[1], [0], [0], [1], [0, 0, 1, 1], [], []>} : vector<8x8xf32>, vector<8x8xf32>, vector<8x8xf32> -> vector<8x8xf32>
    %25 = vector.extract_strided_slice %7 {offsets = [0, 8], sizes = [8, 8], strides = [1, 1]} : vector<8x32xf32> to vector<8x8xf32>
    %26 = vector.extract_strided_slice %8 {offsets = [0, 8], sizes = [8, 8], strides = [1, 1]} : vector<8x32xf32> to vector<8x8xf32>
    %27 = vector.extract_strided_slice %9 {offsets = [0, 8], sizes = [8, 8], strides = [1, 1]} : vector<8x32xf32> to vector<8x8xf32>
    %cst_10 = arith.constant dense<0.000000e+00> : vector<8x8xf32>
    %28 = tpu.matmul %25, %26, %cst_10 {dimension_numbers = #tpu.dot_dimension_numbers<[1], [1], [0], [0], [0, 0, 1, 0], [], []>} : vector<8x8xf32>, vector<8x8xf32>, vector<8x8xf32> -> vector<8x8xf32>
    %cst_11 = arith.constant dense<0xFF800000> : vector<8xf32>
    %29 = vector.multi_reduction <maximumf>, %28, %cst_11 [1] : vector<8x8xf32> to vector<8xf32>
    %30 = vector.shape_cast %29 : vector<8xf32> to vector<8x1xf32>
    %31 = vector.broadcast %30 : vector<8x1xf32> to vector<8x8xf32>
    %32 = arith.subf %28, %31 : vector<8x8xf32>
    %33 = math.exp %32 : vector<8x8xf32>
    %cst_12 = arith.constant dense<0.000000e+00> : vector<8xf32>
    %34 = vector.multi_reduction <add>, %33, %cst_12 [1] : vector<8x8xf32> to vector<8xf32>
    %35 = vector.shape_cast %34 : vector<8xf32> to vector<8x1xf32>
    %36 = tpu.reciprocal %35 {approx = true} : vector<8x1xf32> -> vector<8x1xf32>
    %37 = vector.broadcast %36 : vector<8x1xf32> to vector<8x8xf32>
    %38 = arith.mulf %33, %37 : vector<8x8xf32>
    %cst_13 = arith.constant dense<0.000000e+00> : vector<8x8xf32>
    %39 = tpu.matmul %38, %27, %cst_13 {dimension_numbers = #tpu.dot_dimension_numbers<[1], [0], [0], [1], [0, 0, 1, 1], [], []>} : vector<8x8xf32>, vector<8x8xf32>, vector<8x8xf32> -> vector<8x8xf32>
    %40 = vector.extract_strided_slice %7 {offsets = [0, 16], sizes = [8, 8], strides = [1, 1]} : vector<8x32xf32> to vector<8x8xf32>
    %41 = vector.extract_strided_slice %8 {offsets = [0, 16], sizes = [8, 8], strides = [1, 1]} : vector<8x32xf32> to vector<8x8xf32>
    %42 = vector.extract_strided_slice %9 {offsets = [0, 16], sizes = [8, 8], strides = [1, 1]} : vector<8x32xf32> to vector<8x8xf32>
    %cst_14 = arith.constant dense<0.000000e+00> : vector<8x8xf32>
    %43 = tpu.matmul %40, %41, %cst_14 {dimension_numbers = #tpu.dot_dimension_numbers<[1], [1], [0], [0], [0, 0, 1, 0], [], []>} : vector<8x8xf32>, vector<8x8xf32>, vector<8x8xf32> -> vector<8x8xf32>
    %cst_15 = arith.constant dense<0xFF800000> : vector<8xf32>
    %44 = vector.multi_reduction <maximumf>, %43, %cst_15 [1] : vector<8x8xf32> to vector<8xf32>
    %45 = vector.shape_cast %44 : vector<8xf32> to vector<8x1xf32>
    %46 = vector.broadcast %45 : vector<8x1xf32> to vector<8x8xf32>
    %47 = arith.subf %43, %46 : vector<8x8xf32>
    %48 = math.exp %47 : vector<8x8xf32>
    %cst_16 = arith.constant dense<0.000000e+00> : vector<8xf32>
    %49 = vector.multi_reduction <add>, %48, %cst_16 [1] : vector<8x8xf32> to vector<8xf32>
    %50 = vector.shape_cast %49 : vector<8xf32> to vector<8x1xf32>
    %51 = tpu.reciprocal %50 {approx = true} : vector<8x1xf32> -> vector<8x1xf32>
    %52 = vector.broadcast %51 : vector<8x1xf32> to vector<8x8xf32>
    %53 = arith.mulf %48, %52 : vector<8x8xf32>
    %cst_17 = arith.constant dense<0.000000e+00> : vector<8x8xf32>
    %54 = tpu.matmul %53, %42, %cst_17 {dimension_numbers = #tpu.dot_dimension_numbers<[1], [0], [0], [1], [0, 0, 1, 1], [], []>} : vector<8x8xf32>, vector<8x8xf32>, vector<8x8xf32> -> vector<8x8xf32>
    %55 = vector.extract_strided_slice %7 {offsets = [0, 24], sizes = [8, 8], strides = [1, 1]} : vector<8x32xf32> to vector<8x8xf32>
    %56 = vector.extract_strided_slice %8 {offsets = [0, 24], sizes = [8, 8], strides = [1, 1]} : vector<8x32xf32> to vector<8x8xf32>
    %57 = vector.extract_strided_slice %9 {offsets = [0, 24], sizes = [8, 8], strides = [1, 1]} : vector<8x32xf32> to vector<8x8xf32>
    %cst_18 = arith.constant dense<0.000000e+00> : vector<8x8xf32>
    %58 = tpu.matmul %55, %56, %cst_18 {dimension_numbers = #tpu.dot_dimension_numbers<[1], [1], [0], [0], [0, 0, 1, 0], [], []>} : vector<8x8xf32>, vector<8x8xf32>, vector<8x8xf32> -> vector<8x8xf32>
    %cst_19 = arith.constant dense<0xFF800000> : vector<8xf32>
    %59 = vector.multi_reduction <maximumf>, %58, %cst_19 [1] : vector<8x8xf32> to vector<8xf32>
    %60 = vector.shape_cast %59 : vector<8xf32> to vector<8x1xf32>
    %61 = vector.broadcast %60 : vector<8x1xf32> to vector<8x8xf32>
    %62 = arith.subf %58, %61 : vector<8x8xf32>
    %63 = math.exp %62 : vector<8x8xf32>
    %cst_20 = arith.constant dense<0.000000e+00> : vector<8xf32>
    %64 = vector.multi_reduction <add>, %63, %cst_20 [1] : vector<8x8xf32> to vector<8xf32>
    %65 = vector.shape_cast %64 : vector<8xf32> to vector<8x1xf32>
    %66 = tpu.reciprocal %65 {approx = true} : vector<8x1xf32> -> vector<8x1xf32>
    %67 = vector.broadcast %66 : vector<8x1xf32> to vector<8x8xf32>
    %68 = arith.mulf %63, %67 : vector<8x8xf32>
    %cst_21 = arith.constant dense<0.000000e+00> : vector<8x8xf32>
    %69 = tpu.matmul %68, %57, %cst_21 {dimension_numbers = #tpu.dot_dimension_numbers<[1], [0], [0], [1], [0, 0, 1, 1], [], []>} : vector<8x8xf32>, vector<8x8xf32>, vector<8x8xf32> -> vector<8x8xf32>
    %70 = tpu.concatenate %24, %39, %54, %69 in 1 : vector<8x8xf32>, vector<8x8xf32>, vector<8x8xf32>, vector<8x8xf32> -> vector<8x32xf32>
    %71 = math.tanh %70 : vector<8x32xf32>
    %c0_22 = arith.constant 0 : index
    %c0_23 = arith.constant 0 : index
    %c0_24 = arith.constant 0 : index
    %72 = vector.load %arg4[%c0_22, %c0_23, %c0_24] : memref<2x8x32xf32, #tpu.memory_space<vmem>>, vector<1x8x32xf32>
    %73 = vector.shape_cast %72 : vector<1x8x32xf32> to vector<8x32xf32>
    %74 = vector.shape_cast %71 : vector<8x32xf32> to vector<1x8x32xf32>
    tpu.vector_store %arg4[%c0_22, %c0_23, %c0_24], %74 {strides = array<i32>} : memref<2x8x32xf32, #tpu.memory_space<vmem>>, vector<1x8x32xf32>,
    %75 = vector.extract_strided_slice %6 {offsets = [8, 0], sizes = [8, 32], strides = [1, 1]} : vector<16x96xf32> to vector<8x32xf32>
    %76 = vector.extract_strided_slice %6 {offsets = [8, 32], sizes = [8, 32], strides = [1, 1]} : vector<16x96xf32> to vector<8x32xf32>
    %77 = vector.extract_strided_slice %6 {offsets = [8, 64], sizes = [8, 32], strides = [1, 1]} : vector<16x96xf32> to vector<8x32xf32>
    %78 = vector.extract_strided_slice %75 {offsets = [0, 0], sizes = [8, 8], strides = [1, 1]} : vector<8x32xf32> to vector<8x8xf32>
    %79 = vector.extract_strided_slice %76 {offsets = [0, 0], sizes = [8, 8], strides = [1, 1]} : vector<8x32xf32> to vector<8x8xf32>
    %80 = vector.extract_strided_slice %77 {offsets = [0, 0], sizes = [8, 8], strides = [1, 1]} : vector<8x32xf32> to vector<8x8xf32>
    %cst_25 = arith.constant dense<0.000000e+00> : vector<8x8xf32>
    %81 = tpu.matmul %78, %79, %cst_25 {dimension_numbers = #tpu.dot_dimension_numbers<[1], [1], [0], [0], [0, 0, 1, 0], [], []>} : vector<8x8xf32>, vector<8x8xf32>, vector<8x8xf32> -> vector<8x8xf32>
    %cst_26 = arith.constant dense<0xFF800000> : vector<8xf32>
    %82 = vector.multi_reduction <maximumf>, %81, %cst_26 [1] : vector<8x8xf32> to vector<8xf32>
    %83 = vector.shape_cast %82 : vector<8xf32> to vector<8x1xf32>
    %84 = vector.broadcast %83 : vector<8x1xf32> to vector<8x8xf32>
    %85 = arith.subf %81, %84 : vector<8x8xf32>
    %86 = math.exp %85 : vector<8x8xf32>
    %cst_27 = arith.constant dense<0.000000e+00> : vector<8xf32>
    %87 = vector.multi_reduction <add>, %86, %cst_27 [1] : vector<8x8xf32> to vector<8xf32>
    %88 = vector.shape_cast %87 : vector<8xf32> to vector<8x1xf32>
    %89 = tpu.reciprocal %88 {approx = true} : vector<8x1xf32> -> vector<8x1xf32>
    %90 = vector.broadcast %89 : vector<8x1xf32> to vector<8x8xf32>
    %91 = arith.mulf %86, %90 : vector<8x8xf32>
    %cst_28 = arith.constant dense<0.000000e+00> : vector<8x8xf32>
    %92 = tpu.matmul %91, %80, %cst_28 {dimension_numbers = #tpu.dot_dimension_numbers<[1], [0], [0], [1], [0, 0, 1, 1], [], []>} : vector<8x8xf32>, vector<8x8xf32>, vector<8x8xf32> -> vector<8x8xf32>
    %93 = vector.extract_strided_slice %75 {offsets = [0, 8], sizes = [8, 8], strides = [1, 1]} : vector<8x32xf32> to vector<8x8xf32>
    %94 = vector.extract_strided_slice %76 {offsets = [0, 8], sizes = [8, 8], strides = [1, 1]} : vector<8x32xf32> to vector<8x8xf32>
    %95 = vector.extract_strided_slice %77 {offsets = [0, 8], sizes = [8, 8], strides = [1, 1]} : vector<8x32xf32> to vector<8x8xf32>
    %cst_29 = arith.constant dense<0.000000e+00> : vector<8x8xf32>
    %96 = tpu.matmul %93, %94, %cst_29 {dimension_numbers = #tpu.dot_dimension_numbers<[1], [1], [0], [0], [0, 0, 1, 0], [], []>} : vector<8x8xf32>, vector<8x8xf32>, vector<8x8xf32> -> vector<8x8xf32>
    %cst_30 = arith.constant dense<0xFF800000> : vector<8xf32>
    %97 = vector.multi_reduction <maximumf>, %96, %cst_30 [1] : vector<8x8xf32> to vector<8xf32>
    %98 = vector.shape_cast %97 : vector<8xf32> to vector<8x1xf32>
    %99 = vector.broadcast %98 : vector<8x1xf32> to vector<8x8xf32>
    %100 = arith.subf %96, %99 : vector<8x8xf32>
    %101 = math.exp %100 : vector<8x8xf32>
    %cst_31 = arith.constant dense<0.000000e+00> : vector<8xf32>
    %102 = vector.multi_reduction <add>, %101, %cst_31 [1] : vector<8x8xf32> to vector<8xf32>
    %103 = vector.shape_cast %102 : vector<8xf32> to vector<8x1xf32>
    %104 = tpu.reciprocal %103 {approx = true} : vector<8x1xf32> -> vector<8x1xf32>
    %105 = vector.broadcast %104 : vector<8x1xf32> to vector<8x8xf32>
    %106 = arith.mulf %101, %105 : vector<8x8xf32>
    %cst_32 = arith.constant dense<0.000000e+00> : vector<8x8xf32>
    %107 = tpu.matmul %106, %95, %cst_32 {dimension_numbers = #tpu.dot_dimension_numbers<[1], [0], [0], [1], [0, 0, 1, 1], [], []>} : vector<8x8xf32>, vector<8x8xf32>, vector<8x8xf32> -> vector<8x8xf32>
    %108 = vector.extract_strided_slice %75 {offsets = [0, 16], sizes = [8, 8], strides = [1, 1]} : vector<8x32xf32> to vector<8x8xf32>
    %109 = vector.extract_strided_slice %76 {offsets = [0, 16], sizes = [8, 8], strides = [1, 1]} : vector<8x32xf32> to vector<8x8xf32>
    %110 = vector.extract_strided_slice %77 {offsets = [0, 16], sizes = [8, 8], strides = [1, 1]} : vector<8x32xf32> to vector<8x8xf32>
    %cst_33 = arith.constant dense<0.000000e+00> : vector<8x8xf32>
    %111 = tpu.matmul %108, %109, %cst_33 {dimension_numbers = #tpu.dot_dimension_numbers<[1], [1], [0], [0], [0, 0, 1, 0], [], []>} : vector<8x8xf32>, vector<8x8xf32>, vector<8x8xf32> -> vector<8x8xf32>
    %cst_34 = arith.constant dense<0xFF800000> : vector<8xf32>
    %112 = vector.multi_reduction <maximumf>, %111, %cst_34 [1] : vector<8x8xf32> to vector<8xf32>
    %113 = vector.shape_cast %112 : vector<8xf32> to vector<8x1xf32>
    %114 = vector.broadcast %113 : vector<8x1xf32> to vector<8x8xf32>
    %115 = arith.subf %111, %114 : vector<8x8xf32>
    %116 = math.exp %115 : vector<8x8xf32>
    %cst_35 = arith.constant dense<0.000000e+00> : vector<8xf32>
    %117 = vector.multi_reduction <add>, %116, %cst_35 [1] : vector<8x8xf32> to vector<8xf32>
    %118 = vector.shape_cast %117 : vector<8xf32> to vector<8x1xf32>
    %119 = tpu.reciprocal %118 {approx = true} : vector<8x1xf32> -> vector<8x1xf32>
    %120 = vector.broadcast %119 : vector<8x1xf32> to vector<8x8xf32>
    %121 = arith.mulf %116, %120 : vector<8x8xf32>
    %cst_36 = arith.constant dense<0.000000e+00> : vector<8x8xf32>
    %122 = tpu.matmul %121, %110, %cst_36 {dimension_numbers = #tpu.dot_dimension_numbers<[1], [0], [0], [1], [0, 0, 1, 1], [], []>} : vector<8x8xf32>, vector<8x8xf32>, vector<8x8xf32> -> vector<8x8xf32>
    %123 = vector.extract_strided_slice %75 {offsets = [0, 24], sizes = [8, 8], strides = [1, 1]} : vector<8x32xf32> to vector<8x8xf32>
    %124 = vector.extract_strided_slice %76 {offsets = [0, 24], sizes = [8, 8], strides = [1, 1]} : vector<8x32xf32> to vector<8x8xf32>
    %125 = vector.extract_strided_slice %77 {offsets = [0, 24], sizes = [8, 8], strides = [1, 1]} : vector<8x32xf32> to vector<8x8xf32>
    %cst_37 = arith.constant dense<0.000000e+00> : vector<8x8xf32>
    %126 = tpu.matmul %123, %124, %cst_37 {dimension_numbers = #tpu.dot_dimension_numbers<[1], [1], [0], [0], [0, 0, 1, 0], [], []>} : vector<8x8xf32>, vector<8x8xf32>, vector<8x8xf32> -> vector<8x8xf32>
    %cst_38 = arith.constant dense<0xFF800000> : vector<8xf32>
    %127 = vector.multi_reduction <maximumf>, %126, %cst_38 [1] : vector<8x8xf32> to vector<8xf32>
    %128 = vector.shape_cast %127 : vector<8xf32> to vector<8x1xf32>
    %129 = vector.broadcast %128 : vector<8x1xf32> to vector<8x8xf32>
    %130 = arith.subf %126, %129 : vector<8x8xf32>
    %131 = math.exp %130 : vector<8x8xf32>
    %cst_39 = arith.constant dense<0.000000e+00> : vector<8xf32>
    %132 = vector.multi_reduction <add>, %131, %cst_39 [1] : vector<8x8xf32> to vector<8xf32>
    %133 = vector.shape_cast %132 : vector<8xf32> to vector<8x1xf32>
    %134 = tpu.reciprocal %133 {approx = true} : vector<8x1xf32> -> vector<8x1xf32>
    %135 = vector.broadcast %134 : vector<8x1xf32> to vector<8x8xf32>
    %136 = arith.mulf %131, %135 : vector<8x8xf32>
    %cst_40 = arith.constant dense<0.000000e+00> : vector<8x8xf32>
    %137 = tpu.matmul %136, %125, %cst_40 {dimension_numbers = #tpu.dot_dimension_numbers<[1], [0], [0], [1], [0, 0, 1, 1], [], []>} : vector<8x8xf32>, vector<8x8xf32>, vector<8x8xf32> -> vector<8x8xf32>
    %138 = tpu.concatenate %92, %107, %122, %137 in 1 : vector<8x8xf32>, vector<8x8xf32>, vector<8x8xf32>, vector<8x8xf32> -> vector<8x32xf32>
    %139 = math.tanh %138 : vector<8x32xf32>
    %c1 = arith.constant 1 : index
    %c0_41 = arith.constant 0 : index
    %c0_42 = arith.constant 0 : index
    %140 = vector.load %arg4[%c1, %c0_41, %c0_42] : memref<2x8x32xf32, #tpu.memory_space<vmem>>, vector<1x8x32xf32>
    %141 = vector.shape_cast %140 : vector<1x8x32xf32> to vector<8x32xf32>
    %142 = vector.shape_cast %139 : vector<8x32xf32> to vector<1x8x32xf32>
    tpu.vector_store %arg4[%c1, %c0_41, %c0_42], %142 {strides = array<i32>} : memref<2x8x32xf32, #tpu.memory_space<vmem>>, vector<1x8x32xf32>,
    return
  }
  func.func @transform_0(%arg0: i32) -> (i32, i32, i32) {
    %c0_i32 = arith.constant 0 : i32
    %c0_i32_0 = arith.constant 0 : i32
    %c0_i32_1 = arith.constant 0 : i32
    return %arg0, %c0_i32, %c0_i32_0 : i32, i32, i32
  }
  func.func @transform_1(%arg0: i32) -> (i32, i32) {
    %c0_i32 = arith.constant 0 : i32
    %c0_i32_0 = arith.constant 0 : i32
    %c0_i32_1 = arith.constant 0 : i32
    return %c0_i32, %c0_i32_0 : i32, i32
  }
  func.func @transform_2(%arg0: i32) -> (i32, i32) {
    %c0_i32 = arith.constant 0 : i32
    %c0_i32_0 = arith.constant 0 : i32
    %c0_i32_1 = arith.constant 0 : i32
    return %c0_i32, %c0_i32_0 : i32, i32
  }
  func.func @transform_3(%arg0: i32) -> (i32, i32, i32) {
    %c0_i32 = arith.constant 0 : i32
    %c0_i32_0 = arith.constant 0 : i32
    %c0_i32_1 = arith.constant 0 : i32
    return %arg0, %c0_i32, %c0_i32_0 : i32, i32, i32
  }
}

</mosaic_0001>

<bundles_post_ra>
// kernel: tpu_custom_call.1
= control target key start
LH: loop header
LB: loop body
LE: loop exit
PB: predicated region body
PF: predicated region fallthrough
CT: control target
= control target key end

     0   :  { %8 = vsyncpa [#allocation3], 0  ;;  %s2043_s0 = inlined_call_operand.hbm [shape: f32[2,8,32], index: 0, kind: input, shape index: {}]   ;;  %s2044_s1 = inlined_call_operand.hbm [shape: f32[32,96], index: 1, kind: input, shape index: {}]   ;;  %s2045_s2 = inlined_call_operand.vmem [shape: f32[1,96], index: 2, kind: input, shape index: {}]   ;;  %s2046_s3 = inlined_call_operand.hbm [shape: f32[2,8,32], index: 3, kind: output, shape index: {}]  }
   0x1   :  { %9 = vsyncpa [#allocation6], 0 }
   0x2   :  { %10 = vsyncpa [#allocation4], 0  ;;  %s1804_s12 = smov [#allocation2]   ;;  %s1732_s16 = scalar_lea.hbm %s2043_s0, 256 }
   0x3   :  { %s16_s13 = sshll.u32 %s1804_s12, 4  ;;  %p1733_p0 = scmp.ne.s32.totalorder %s2043_s0, %s1732_s16  ;;  %s17_s13 = int_to_ptr.vmem [resolvable:$true] %s16_s13 }
   0x4   :  { %p1736_p1 = scmp.lt.u32.totalorder %s1732_s16, %s2043_s0 }
   0x6   :  { %p1738_p2 = pnand %p1736_p1, %p1733_p0 }
   0x8   :  { %1741 = shalt.err (!%p1738_p2)
}
   0x9   :  { %s1742_s21 = scalar_lea.vmem %s17_s13, 256  ;;  %p1747_p4 = scmp.lt.s32.totalorder %s17_s13, %s17_s13 }
   0xa   :  { %p1743_p3 = scmp.ne.s32.totalorder %s17_s13, %s1742_s21  ;;  %p1748_p5 = scmp.lt.s32.totalorder %s1742_s21, %s1742_s21 }
   0xc   :  { %p1749_p6 = por %p1748_p5, %p1747_p4 }
   0xe   :  { %p1750_p7 = pnand %p1749_p6, %p1743_p3 }
  0x10   :  { %1753 = shalt.err (!%p1750_p7)
}
  0x11   :  { %s1805_s22 = smov 128   ;;  %s1806_s23 = smov 8  }
  0x12   :  { %22 = dma.hbm_to_vmem [thread:$0]  %s2043_s0, 256, %s17_s13, [#allocation3], %s1805_s22, %s1805_s22, %s1806_s23  }
  0x13   :  { %s1807_s26 = smov [#allocation5]   ;;  %s1754_s30 = scalar_lea.hbm %s2044_s1, 512 }
  0x14   :  { %s28_s27 = sshll.u32 %s1807_s26, 4  ;;  %p1755_p8 = scmp.ne.s32.totalorder %s2044_s1, %s1754_s30  ;;  %s29_s27 = int_to_ptr.vmem [resolvable:$true] %s28_s27 }
  0x15   :  { %p1758_p9 = scmp.lt.u32.totalorder %s1754_s30, %s2044_s1 }
  0x17   :  { %p1760_p10 = pnand %p1758_p9, %p1755_p8 }
  0x19   :  { %1763 = shalt.err (!%p1760_p10)
}
  0x1a   :  { %s1764_s8 = scalar_lea.vmem %s29_s27, 512  ;;  %p1769_p12 = scmp.lt.s32.totalorder %s29_s27, %s29_s27 }
  0x1b   :  { %p1765_p11 = scmp.ne.s32.totalorder %s29_s27, %s1764_s8  ;;  %p1770_p13 = scmp.lt.s32.totalorder %s1764_s8, %s1764_s8 }
  0x1d   :  { %p1771_p0 = por %p1770_p13, %p1769_p12 }
  0x1f   :  { %p1772_p1 = pnand %p1771_p0, %p1765_p11 }
  0x21   :  { %1775 = shalt.err (!%p1772_p1)
}
  0x22   :  { %34 = dma.hbm_to_vmem [thread:$0]  %s2044_s1, 512, %s29_s27, [#allocation6], %s1805_s22, %s1805_s22, %s1806_s23  }
  0x23   :  { %1798 = dma.done.wait [#allocation3], 256  }
  0x24   :  { %1799 = vsyncadd [#allocation3], 4294967040 }
  0x25   :  { %1800 = dma.done.wait [#allocation6], 512  }
  0x26   :  { %1801 = vsyncadd [#allocation6], 4294966784  ;;  %vm56_vm0 = vcmask 261120   ;;  %v45_v0 = vld [vmem:[#allocation5] sm:$0xff]  ;;  %v46_v1 = vld [vmem:[#allocation5 + $0x8] sm:$0xff]  ;;  %v1808_v8 = vmov 0.0  }
  0x27   :  { %v47_v2 = vld [vmem:[#allocation5 + $0x10] sm:$0xff]  ;;  %v1668_v3 = vpack.c.bf16 %v46_v1, %v45_v0  ;;  %v48_v4 = vld [vmem:[#allocation5 + $0x18] sm:$0xff]  ;;  %1588 = vmatprep.subr.mxu1 %v1808_v8  ;;  %vm1809_vm1 = vmmov 0   ;;  %s1810_s11 = smov 120   ;;  %s1811_s12 = smov 96   ;;  %vm141_vm2 = vcmask 64512  }
  0x28   :  { %v43_v5 = vld [vmem:[#allocation2] sm:$0xff]  ;;  %v1672_v6 = vpack.c.bf16 %v48_v4, %v47_v2  ;;  %v44_v7 = vld [vmem:[#allocation2 + $0x8] sm:$0xff]  ;;  %1590 = vmatprep.mubr.msk.f32.mxu1 %vm1809_vm1, %v1808_v8  ;;  %s1812_s13 = smov 80   ;;  %s1813_s14 = smov 88   ;;  %vm811_vm3 = vcmask 130048   ;;  %vm813_vm4 = vcmask 195584  }
  0x29   :  { %1585 = vmatprep.mubr.msk.f32.mxu0 %vm56_vm0, %v43_v5  ;;  %1669 = vmatprep.subr.bf16.mxu0 %v1668_v3  ;;  %v1512_v9 = vld [vmem:[%s2045_s2] ss:$0 sm:$0xff]  ;;  %s1814_s15 = smov 72   ;;  %s1815_s2 = smov 112  }
  0x2a   :  { %1671 = vmatpush3.bf16.msra.mxu0 %v1668_v3  ;;  %s1816_s16 = smov 104   ;;  %s1817_s17 = smov 56  }
  0x2b   :  { %1673 = vmatprep.subr.bf16.mxu0 %v1672_v6  ;;  %s1818_s18 = smov 64   ;;  %s1819_s19 = smov 40  }
  0x2c   :  { %s1820_s20 = smov 48   ;;  %s1821_s21 = smov 16  }
  0x2d   :  { %s1822_s24 = smov 24   ;;  %s1823_s25 = smov [#allocation7]  }
  0x2e   :  { %1675 = vmatpush3.bf16.msra.mxu0 %v1672_v6  ;;  %s1499_s26 = sshll.u32 %s1823_s25, 4  ;;  %s1500_s26 = int_to_ptr.vmem [resolvable:$true] %s1499_s26 }
  0x2f   :  { %1598 = vmatprep.subr.mxu0 %v1808_v8  ;;  %s1776_s27 = scalar_lea.vmem %s1500_s26, 256  ;;  %p1781_p3 = scmp.lt.s32.totalorder %s1500_s26, %s1500_s26 }
  0x30   :  { %p1777_p2 = scmp.ne.s32.totalorder %s1500_s26, %s1776_s27  ;;  %p1782_p4 = scmp.lt.s32.totalorder %s1776_s27, %s1776_s27 }
  0x31   :  { %1586 = vmatmul.mubr.msk.f32.vlgmr.msra.gmra.mrb[0].mxu0 %vm56_vm0, %v44_v7 }
  0x32   :  { %1600 = vmatprep.mubr.msk.f32.mxu0 %vm1809_vm1, %v1808_v8  ;;  %p1783_p5 = por %p1782_p4, %p1781_p3 }
  0x34   :  { %p1784_p6 = pnand %p1783_p5, %p1777_p2 }
 0x104   :  { %v1587_v10 = vpop.f32.mrb[0].mxu0 }
 0x105   :  { %v129_v11 = vpop.f32.mrb[1].mxu0  ;;  %v1893_v13 = vadd.f32 %v1587_v10, %v1512_v9 }
 0x106   :  { %v1885_v12 = vadd.f32 %v1512_v9, %v129_v11 }
 0x108   :  { %303 = vrot.lane.b32.xlu1 %v1885_v12, %s1810_s11  ;;  %139 = vrot.lane.b32.xlu0 %v1885_v12, %s1811_s12 }
 0x10c   :  { %470 = vrot.lane.b32.xlu1 %v1885_v12, %s1812_s13  ;;  %305 = vrot.lane.b32.xlu0 %v1885_v12, %s1813_s14 }
 0x110   :  { %635 = vrot.lane.b32.xlu1 %v1885_v12, %s1814_s15  ;;  %468 = vrot.lane.b32.xlu0 %v1885_v12, %s1815_s2 }
 0x114   :  { %818 = vrot.lane.b32.xlu1 %v1893_v13, %s1811_s12  ;;  %633 = vrot.lane.b32.xlu0 %v1885_v12, %s1816_s16 }
 0x118   :  { %981 = vrot.lane.b32.xlu1 %v1893_v13, %s1810_s11  ;;  %983 = vrot.lane.b32.xlu0 %v1893_v13, %s1813_s14 }
 0x11c   :  { %1146 = vrot.lane.b32.xlu1 %v1893_v13, %s1815_s2  ;;  %1148 = vrot.lane.b32.xlu0 %v1893_v13, %s1812_s13 }
 0x120   :  { %1311 = vrot.lane.b32.xlu1 %v1893_v13, %s1816_s16  ;;  %1313 = vrot.lane.b32.xlu0 %v1893_v13, %s1814_s15 }
 0x124   :  { %392 = vrot.lane.b32.xlu1 %v1885_v12, %s1817_s17  ;;  %227 = vrot.lane.b32.xlu0 %v1885_v12, %s1818_s18 }
 0x17a   :  { %v304_v14 = vpop.permute.xlu1 %303  ;;  %v140_v15 = vpop.permute.xlu0 %139 }
 0x17b   :  { %1589 = vmatpush3.xpose.msk.msra.mxu1 %vm141_vm2, %v140_v15 }
 0x17c   :  { %1593 = vmatprep.subr.mxu1 %v1808_v8 }
 0x17e   :  { %v471_v16 = vpop.permute.xlu1 %470  ;;  %1591 = vmatmul.mubr.msk.f32.vlgmr.msra.gmra.mrb[0].mxu1 %vm141_vm2, %v1885_v12  ;;  %v306_v17 = vpop.permute.xlu0 %305 }
 0x17f   :  { %1599 = vmatpush3.xpose.msk.msra.mxu0 %vm141_vm2, %v306_v17  ;;  %1595 = vmatprep.mubr.msk.f32.mxu1 %vm1809_vm1, %v1808_v8 }
 0x180   :  { %1608 = vmatprep.subr.mxu0 %v1808_v8 }
 0x182   :  { %v636_v18 = vpop.permute.xlu1 %635  ;;  %1601 = vmatmul.mubr.msk.f32.vlgmr.msra.gmra.mrb[2].mxu0 %vm141_vm2, %v304_v14  ;;  %v469_v19 = vpop.permute.xlu0 %468 }
 0x183   :  { %1609 = vmatpush3.xpose.msk.msra.mxu0 %vm141_vm2, %v471_v16  ;;  %1610 = vmatprep.mubr.msk.f32.mxu0 %vm1809_vm1, %v1808_v8 }
 0x184   :  { %1618 = vmatprep.subr.mxu0 %v1808_v8 }
 0x186   :  { %1611 = vmatmul.mubr.msk.f32.vlgmr.msra.gmra.mrb[4].mxu0 %vm141_vm2, %v469_v19  ;;  %v634_v20 = vpop.permute.xlu0 %633  ;;  %v819_v21 = vpop.permute.xlu1 %818 }
 0x187   :  { %1619 = vmatpush3.xpose.msk.msra.mxu0 %vm141_vm2, %v636_v18  ;;  %1620 = vmatprep.mubr.msk.f32.mxu0 %vm1809_vm1, %v1808_v8 }
 0x188   :  { %1628 = vmatprep.subr.mxu0 %v1808_v8 }
 0x18a   :  { %1621 = vmatmul.mubr.msk.f32.vlgmr.msra.gmra.mrb[6].mxu0 %vm141_vm2, %v634_v20  ;;  %v984_v22 = vpop.permute.xlu0 %983  ;;  %v982_v23 = vpop.permute.xlu1 %981 }
 0x18b   :  { %1629 = vmatpush3.xpose.msk.msra.mxu0 %vm141_vm2, %v819_v21  ;;  %1630 = vmatprep.mubr.msk.f32.mxu0 %vm1809_vm1, %v1808_v8 }
 0x18c   :  { %1638 = vmatprep.subr.mxu0 %v1808_v8 }
 0x18e   :  { %1631 = vmatmul.mubr.msk.f32.vlgmr.msra.gmra.mrb[8].mxu0 %vm141_vm2, %v1893_v13  ;;  %v1149_v24 = vpop.permute.xlu0 %1148  ;;  %v1147_v26 = vpop.permute.xlu1 %1146 }
 0x18f   :  { %1639 = vmatpush3.xpose.msk.msra.mxu0 %vm141_vm2, %v984_v22  ;;  %1640 = vmatprep.mubr.msk.f32.mxu0 %vm1809_vm1, %v1808_v8 }
 0x190   :  { %1648 = vmatprep.subr.mxu0 %v1808_v8 }
 0x192   :  { %1641 = vmatmul.mubr.msk.f32.vlgmr.msra.gmra.mrb[10].mxu0 %vm141_vm2, %v982_v23  ;;  %v1314_v25 = vpop.permute.xlu0 %1313  ;;  %v1312_v28 = vpop.permute.xlu1 %1311 }
 0x193   :  { %1649 = vmatpush3.xpose.msk.msra.mxu0 %vm141_vm2, %v1149_v24  ;;  %1650 = vmatprep.mubr.msk.f32.mxu0 %vm1809_vm1, %v1808_v8 }
 0x194   :  { %1658 = vmatprep.subr.mxu0 %v1808_v8 }
 0x196   :  { %1651 = vmatmul.mubr.msk.f32.vlgmr.msra.gmra.mrb[12].mxu0 %vm141_vm2, %v1147_v26  ;;  %v228_v27 = vpop.permute.xlu0 %227  ;;  %v1959_v53 = vpop.permute.xlu1 %392 }
 0x197   :  { %1594 = vmatpush3.msra.mxu1 %v228_v27  ;;  %1659 = vmatpush3.xpose.msk.msra.mxu0 %vm141_vm2, %v1314_v25 }
 0x198   :  { %1660 = vmatprep.mubr.msk.f32.mxu0 %vm1809_vm1, %v1808_v8  ;;  %1603 = vmatprep.subr.mxu1 %v1808_v8 }
 0x19a   :  { %1661 = vmatmul.mubr.msk.f32.vlgmr.msra.gmra.mrb[14].mxu0 %vm141_vm2, %v1312_v28 }
 0x251   :  { %v212_v29 = vpop.f32.mrb[0].mxu1 }
 0x252   :  { %v1592_v30 = vpop.f32.mrb[1].mxu1  ;;  %v216_v31 = vsel %vm141_vm2, %v212_v29, -inf }
 0x253   :  { %217 = vmax.xlane.f32.xlu0 %v216_v31 }
 0x255   :  { %v377_v32 = vpop.f32.mrb[2].mxu0 }
 0x256   :  { %v1602_v33 = vpop.f32.mrb[3].mxu0  ;;  %v381_v34 = vsel %vm141_vm2, %v377_v32, -inf }
 0x257   :  { %382 = vmax.xlane.f32.xlu1 %v381_v34 }
 0x259   :  { %v542_v35 = vpop.f32.mrb[4].mxu0 }
 0x25a   :  { %v1612_v36 = vpop.f32.mrb[5].mxu0  ;;  %v546_v37 = vsel %vm141_vm2, %v542_v35, -inf }
 0x25b   :  { %547 = vmax.xlane.f32.xlu0 %v546_v37 }
 0x25d   :  { %v707_v38 = vpop.f32.mrb[6].mxu0 }
 0x25e   :  { %v1622_v39 = vpop.f32.mrb[7].mxu0  ;;  %v711_v40 = vsel %vm141_vm2, %v707_v38, -inf }
 0x25f   :  { %712 = vmax.xlane.f32.xlu0 %v711_v40 }
 0x261   :  { %v890_v41 = vpop.f32.mrb[8].mxu0 }
 0x262   :  { %v1632_v42 = vpop.f32.mrb[9].mxu0  ;;  %v894_v43 = vsel %vm141_vm2, %v890_v41, -inf }
 0x263   :  { %895 = vmax.xlane.f32.xlu1 %v894_v43 }
 0x265   :  { %v1055_v44 = vpop.f32.mrb[10].mxu0 }
 0x266   :  { %v1642_v45 = vpop.f32.mrb[11].mxu0  ;;  %v1059_v46 = vsel %vm141_vm2, %v1055_v44, -inf }
 0x267   :  { %1060 = vmax.xlane.f32.xlu0 %v1059_v46 }
 0x269   :  { %v1220_v47 = vpop.f32.mrb[12].mxu0 }
 0x26a   :  { %v1652_v48 = vpop.f32.mrb[13].mxu0  ;;  %v1224_v49 = vsel %vm141_vm2, %v1220_v47, -inf }
 0x26b   :  { %1225 = vmax.xlane.f32.xlu1 %v1224_v49 }
 0x26d   :  { %v1385_v50 = vpop.f32.mrb[14].mxu0 }
 0x26e   :  { %v1662_v51 = vpop.f32.mrb[15].mxu0  ;;  %v1389_v52 = vsel %vm141_vm2, %v1385_v50, -inf }
 0x26f   :  { %1390 = vmax.xlane.f32.xlu0 %v1389_v52 }
 0x27c   :  { %722 = vrot.lane.b32.xlu1 %v1885_v12, %s1819_s19 }
 0x285   :  { %557 = vrot.lane.b32.xlu0 %v1885_v12, %s1820_s20 }
 0x2e0   :  { %v218_v54 = vpop.xlane.xlu0 %217 }
 0x2e1   :  { %v219_v55 = vsub.f32 %v212_v29, %v218_v54 }
 0x2e3   :  { %v220_v56 = vmul.f32 1.442695, %v219_v55 }
 0x2e4   :  { %v383_v57 = vpop.xlane.xlu1 %382 }
 0x2e5   :  { %1696 = vpow2.f32 %v220_v56  ;;  %v384_v58 = vsub.f32 %v377_v32, %v383_v57 }
 0x2e7   :  { %v385_v59 = vmul.f32 1.442695, %v384_v58 }
 0x2e8   :  { %v548_v60 = vpop.xlane.xlu0 %547 }
 0x2e9   :  { %1698 = vpow2.f32 %v385_v59  ;;  %v549_v61 = vsub.f32 %v542_v35, %v548_v60 }
 0x2eb   :  { %v550_v62 = vmul.f32 1.442695, %v549_v61 }
 0x2ec   :  { %v713_v63 = vpop.xlane.xlu0 %712 }
 0x2ed   :  { %1700 = vpow2.f32 %v550_v62  ;;  %v714_v0 = vsub.f32 %v707_v38, %v713_v63 }
 0x2ef   :  { %v1697_v1 = vpop.eup %1696  ;;  %v715_v2 = vmul.f32 1.442695, %v714_v0 }
 0x2f0   :  { %v222_v3 = vsel %vm141_vm2, %v1697_v1, 0.0  ;;  %v896_v11 = vpop.xlane.xlu1 %895 }
 0x2f1   :  { %1702 = vpow2.f32 %v715_v2  ;;  %223 = vadd.xlane.f32.xlu1 %v222_v3  ;;  %v897_v12 = vsub.f32 %v890_v41, %v896_v11 }
 0x2f3   :  { %v1699_v4 = vpop.eup %1698  ;;  %v898_v17 = vmul.f32 1.442695, %v897_v12 }
 0x2f4   :  { %v387_v5 = vsel %vm141_vm2, %v1699_v4, 0.0  ;;  %v1061_v14 = vpop.xlane.xlu0 %1060 }
 0x2f5   :  { %388 = vadd.xlane.f32.xlu0 %v387_v5  ;;  %v1062_v16 = vsub.f32 %v1055_v44, %v1061_v14  ;;  %1704 = vpow2.f32 %v898_v17 }
 0x2f7   :  { %v1701_v6 = vpop.eup %1700  ;;  %v1063_v20 = vmul.f32 1.442695, %v1062_v16 }
 0x2f8   :  { %v552_v7 = vsel %vm141_vm2, %v1701_v6, 0.0  ;;  %v1226_v15 = vpop.xlane.xlu1 %1225 }
 0x2f9   :  { %553 = vadd.xlane.f32.xlu1 %v552_v7  ;;  %v1227_v18 = vsub.f32 %v1220_v47, %v1226_v15  ;;  %1706 = vpow2.f32 %v1063_v20 }
 0x2fb   :  { %v1964_v9 = vpop.eup %1702  ;;  %v1228_v21 = vmul.f32 1.442695, %v1227_v18 }
 0x2fc   :  { %v717_v10 = vsel %vm141_vm2, %v1964_v9, 0.0  ;;  %v1391_v19 = vpop.xlane.xlu0 %1390  ;;  %v723_v32 = vpop.permute.xlu1 %722 }
 0x2fd   :  { %718 = vadd.xlane.f32.xlu0 %v717_v10  ;;  %v1392_v22 = vsub.f32 %v1385_v50, %v1391_v19  ;;  %1708 = vpow2.f32 %v1228_v21 }
 0x2ff   :  { %v1393_v23 = vmul.f32 1.442695, %v1392_v22  ;;  %v1705_v24 = vpop.eup %1704 }
 0x300   :  { %v900_v26 = vsel %vm141_vm2, %v1705_v24, 0.0  ;;  %v558_v33 = vpop.permute.xlu0 %557 }
 0x301   :  { %1710 = vpow2.f32 %v1393_v23 }
 0x303   :  { %v1972_v25 = vpop.eup %1706 }
 0x304   :  { %v1065_v29 = vsel %vm141_vm2, %v1972_v25, 0.0 }
 0x307   :  { %v1975_v27 = vpop.eup %1708 }
 0x308   :  { %v1230_v28 = vsel %vm141_vm2, %v1975_v27, 0.0 }
 0x30a   :  { %1070 = vrot.lane.b32.xlu1 %v1893_v13, %s1817_s17 }
 0x30b   :  { %v1981_v30 = vpop.eup %1710 }
 0x30c   :  { %v1395_v31 = vsel %vm141_vm2, %v1981_v30, 0.0 }
 0x313   :  { %905 = vrot.lane.b32.xlu0 %v1893_v13, %s1818_s18 }
 0x32e   :  { %901 = vadd.xlane.f32.xlu1 %v900_v26 }
 0x332   :  { %1231 = vadd.xlane.f32.xlu1 %v1230_v28  ;;  %1066 = vadd.xlane.f32.xlu0 %v1065_v29 }
 0x336   :  { %1396 = vadd.xlane.f32.xlu1 %v1395_v31 }
 0x347   :  { %1400 = vrot.lane.b32.xlu1 %v1893_v13, %s1819_s19 }
 0x348   :  { %1235 = vrot.lane.b32.xlu0 %v1893_v13, %s1820_s20 }
 0x37e   :  { %v224_v34 = vpop.xlane.xlu1 %223 }
 0x37f   :  { %1712 = vrcp.f32 %v224_v34 }
 0x382   :  { %v389_v35 = vpop.xlane.xlu0 %388 }
 0x383   :  { %1714 = vrcp.f32 %v389_v35 }
 0x386   :  { %v554_v36 = vpop.xlane.xlu1 %553 }
 0x387   :  { %1716 = vrcp.f32 %v554_v36 }
 0x389   :  { %v1713_v37 = vpop.eup %1712 }
 0x38a   :  { %v226_v38 = vmul.f32 %v1713_v37, %v1697_v1  ;;  %v719_v39 = vpop.xlane.xlu0 %718  ;;  %v1071_v46 = vpop.permute.xlu1 %1070 }
 0x38b   :  { %1718 = vrcp.f32 %v719_v39 }
 0x38c   :  { %1596 = vmatmul.mubr.msk.f32.vlgmr.msra.gmra.mrb[2].mxu1 %vm141_vm2, %v226_v38 }
 0x38d   :  { %v1715_v40 = vpop.eup %1714  ;;  %1604 = vmatpush3.msra.mxu1 %v1959_v53  ;;  %1605 = vmatprep.mubr.msk.f32.mxu1 %vm1809_vm1, %v1808_v8 }
 0x38e   :  { %v391_v13 = vmul.f32 %v1715_v40, %v1699_v4  ;;  %1613 = vmatprep.subr.mxu1 %v1808_v8  ;;  %v906_v45 = vpop.permute.xlu0 %905 }
 0x390   :  { %1606 = vmatmul.mubr.msk.f32.vlgmr.msra.gmra.mrb[4].mxu1 %vm141_vm2, %v391_v13 }
 0x391   :  { %v1717_v41 = vpop.eup %1716  ;;  %1614 = vmatpush3.msra.mxu1 %v558_v33  ;;  %1615 = vmatprep.mubr.msk.f32.mxu1 %vm1809_vm1, %v1808_v8 }
 0x392   :  { %v556_v42 = vmul.f32 %v1717_v41, %v1701_v6  ;;  %1623 = vmatprep.subr.mxu1 %v1808_v8 }
 0x394   :  { %1616 = vmatmul.mubr.msk.f32.vlgmr.msra.gmra.mrb[6].mxu1 %vm141_vm2, %v556_v42 }
 0x395   :  { %v1719_v43 = vpop.eup %1718  ;;  %1624 = vmatpush3.msra.mxu1 %v723_v32  ;;  %1625 = vmatprep.mubr.msk.f32.mxu1 %vm1809_vm1, %v1808_v8 }
 0x396   :  { %v721_v44 = vmul.f32 %v1719_v43, %v1964_v9  ;;  %1633 = vmatprep.subr.mxu1 %v1808_v8 }
 0x398   :  { %1626 = vmatmul.mubr.msk.f32.vlgmr.msra.gmra.mrb[8].mxu1 %vm141_vm2, %v721_v44 }
 0x399   :  { %1634 = vmatpush3.msra.mxu1 %v906_v45  ;;  %1635 = vmatprep.mubr.msk.f32.mxu1 %vm1809_vm1, %v1808_v8 }
 0x39a   :  { %1643 = vmatprep.subr.mxu1 %v1808_v8 }
 0x3bb   :  { %v902_v47 = vpop.xlane.xlu1 %901 }
 0x3bc   :  { %1720 = vrcp.f32 %v902_v47 }
 0x3bf   :  { %v1232_v48 = vpop.xlane.xlu1 %1231  ;;  %v1067_v49 = vpop.xlane.xlu0 %1066 }
 0x3c0   :  { %1722 = vrcp.f32 %v1067_v49 }
 0x3c1   :  { %1724 = vrcp.f32 %v1232_v48 }
 0x3c3   :  { %v1397_v50 = vpop.xlane.xlu1 %1396  ;;  %v1236_v56 = vpop.permute.xlu0 %1235 }
 0x3c4   :  { %1726 = vrcp.f32 %v1397_v50 }
 0x3c6   :  { %v1721_v51 = vpop.eup %1720 }
 0x3c7   :  { %v904_v52 = vmul.f32 %v1721_v51, %v1705_v24  ;;  %v1401_v59 = vpop.permute.xlu1 %1400 }
 0x3c9   :  { %1636 = vmatmul.mubr.msk.f32.vlgmr.msra.gmra.mrb[10].mxu1 %vm141_vm2, %v904_v52 }
 0x3ca   :  { %1644 = vmatpush3.msra.mxu1 %v1071_v46  ;;  %1645 = vmatprep.mubr.msk.f32.mxu1 %vm1809_vm1, %v1808_v8  ;;  %v1723_v53 = vpop.eup %1722 }
 0x3cb   :  { %1653 = vmatprep.subr.mxu1 %v1808_v8  ;;  %v1069_v54 = vmul.f32 %v1723_v53, %v1972_v25  ;;  %v1725_v55 = vpop.eup %1724 }
 0x3cc   :  { %v1234_v57 = vmul.f32 %v1725_v55, %v1975_v27 }
 0x3cd   :  { %1646 = vmatmul.mubr.msk.f32.vlgmr.msra.gmra.mrb[12].mxu1 %vm141_vm2, %v1069_v54 }
 0x3ce   :  { %1654 = vmatpush3.msra.mxu1 %v1236_v56  ;;  %1655 = vmatprep.mubr.msk.f32.mxu1 %vm1809_vm1, %v1808_v8  ;;  %v1727_v58 = vpop.eup %1726 }
 0x3cf   :  { %1663 = vmatprep.subr.mxu1 %v1808_v8  ;;  %v1399_v60 = vmul.f32 %v1727_v58, %v1981_v30 }
 0x3d1   :  { %1656 = vmatmul.mubr.msk.f32.vlgmr.msra.gmra.mrb[14].mxu1 %vm141_vm2, %v1234_v57 }
 0x3d2   :  { %1664 = vmatpush3.msra.mxu1 %v1401_v59  ;;  %1665 = vmatprep.mubr.msk.f32.mxu1 %vm1809_vm1, %v1808_v8 }
 0x3d5   :  { %1666 = vmatmul.mubr.msk.f32.vlgmr.msra.gmra.mrb[16].mxu1 %vm141_vm2, %v1399_v60 }
 0x45f   :  { %v299_v61 = vpop.f32.mrb[2].mxu1 }
 0x460   :  { %v1597_v62 = vpop.f32.mrb[3].mxu1 }
 0x463   :  { %v464_v63 = vpop.f32.mrb[4].mxu1 }
 0x464   :  { %799 = vrot.lane.b32.xlu0 %v464_v63, %s1806_s23  ;;  %v1607_v0 = vpop.f32.mrb[5].mxu1 }
 0x467   :  { %v629_v1 = vpop.f32.mrb[6].mxu1 }
 0x468   :  { %803 = vrot.lane.b32.xlu1 %v629_v1, %s1821_s21  ;;  %v1617_v2 = vpop.f32.mrb[7].mxu1 }
 0x46b   :  { %v794_v3 = vpop.f32.mrb[8].mxu1 }
 0x46c   :  { %807 = vrot.lane.b32.xlu0 %v794_v3, %s1822_s24  ;;  %v1627_v4 = vpop.f32.mrb[9].mxu1 }
 0x49c   :  { %v977_v5 = vpop.f32.mrb[10].mxu1 }
 0x49d   :  { %v1637_v8 = vpop.f32.mrb[11].mxu1 }
 0x4a0   :  { %v1142_v6 = vpop.f32.mrb[12].mxu1 }
 0x4a1   :  { %1477 = vrot.lane.b32.xlu1 %v1142_v6, %s1806_s23  ;;  %v1647_v7 = vpop.f32.mrb[13].mxu1 }
 0x4a4   :  { %v1307_v9 = vpop.f32.mrb[14].mxu1 }
 0x4a5   :  { %1481 = vrot.lane.b32.xlu0 %v1307_v9, %s1821_s21  ;;  %v1657_v10 = vpop.f32.mrb[15].mxu1 }
 0x4a8   :  { %v1472_v11 = vpop.f32.mrb[16].mxu1 }
 0x4a9   :  { %1485 = vrot.lane.b32.xlu1 %v1472_v11, %s1822_s24  ;;  %v1667_v12 = vpop.f32.mrb[17].mxu1 }
 0x4d6   :  { %v800_v14 = vpop.permute.xlu0 %799 }
 0x4d7   :  { %v810_v16 = vsel %vm141_vm2, %v299_v61, %v800_v14 }
 0x4da   :  { %v804_v15 = vpop.permute.xlu1 %803 }
 0x4db   :  { %v812_v17 = vsel %vm811_vm3, %v810_v16, %v804_v15 }
 0x4de   :  { %v808_v18 = vpop.permute.xlu0 %807 }
 0x4df   :  { %v814_v19 = vsel %vm813_vm4, %v812_v17, %v808_v18 }
 0x4e0   :  { %1728 = vtanh.f32 %v814_v19 }
 0x4ea   :  { %v1729_v20 = vpop.eup %1728 }
 0x4eb   :  { %816 = vst.msk [vmem:[#allocation7] sm:$0xff] %vm56_vm0, %v1729_v20 }
 0x513   :  { %v1478_v21 = vpop.permute.xlu1 %1477 }
 0x514   :  { %v1488_v23 = vsel %vm141_vm2, %v977_v5, %v1478_v21 }
 0x517   :  { %v1482_v22 = vpop.permute.xlu0 %1481 }
 0x518   :  { %v1489_v24 = vsel %vm811_vm3, %v1488_v23, %v1482_v22 }
 0x51b   :  { %v1486_v25 = vpop.permute.xlu1 %1485 }
 0x51c   :  { %v1490_v26 = vsel %vm813_vm4, %v1489_v24, %v1486_v25 }
 0x51d   :  { %1730 = vtanh.f32 %v1490_v26 }
 0x527   :  { %v1731_v27 = vpop.eup %1730 }
 0x528   :  { %1493 = vst.msk [vmem:[#allocation7 + $0x8] sm:$0xff] %vm56_vm0, %v1731_v27 }
 0x529   :  { %1787 = shalt.err (!%p1784_p6)
}
 0x52a   :  { %s1788_s30 = scalar_lea.hbm %s2046_s3, 256 }
 0x52b   :  { %p1789_p7 = scmp.ne.s32.totalorder %s2046_s3, %s1788_s30  ;;  %p1792_p8 = scmp.lt.u32.totalorder %s1788_s30, %s2046_s3 }
 0x52d   :  { %p1794_p9 = pnand %p1792_p8, %p1789_p7 }
 0x52f   :  { %1797 = shalt.err (!%p1794_p9)
}
 0x530   :  { %1505 = dma.vmem_to_hbm [thread:$0]  %s1500_s26, 256, %s2046_s3, [#allocation4], %s1805_s22, %s1805_s22, %s1806_s23  }
 0x531   :  { %1802 = dma.done.wait [#allocation4], 256  }
 0x532   :  { %1803 = vsyncadd [#allocation4], 4294967040 }
 0x533   :  { %1509 = vsyncpa [#allocation3], 1 }
 0x534   :  { %1510 = vsyncpa [#allocation6], 1 }
 0x535   :  { %1511 = vsyncpa [#allocation4], 1 }

</bundles_post_ra>
